<compile_context>
chip_gen: v7x
topology: tpu7x:2x2x1
jax: 0.10.0
libtpu: 0.0.40
codegen_flags: <defaults>
</compile_context>

<pallas_src>
import functools

import jax
import jax.numpy as jnp
from jax.experimental import pallas as pl
from jax.experimental.pallas import tpu as pltpu


def _mlp_embedder_kernel(x_ref, wi_ref, bi_ref, wo_ref, bo_ref, o_ref):
    # First linear: x @ Wi + bi  (bf16 operands, f32 accumulation on the MXU).
    h = jnp.dot(x_ref[...], wi_ref[...], preferred_element_type=jnp.float32)
    h = h + bi_ref[...]                     # bi is (1, dim), broadcasts over rows
    # SiLU / swish: h * sigmoid(h).  sigmoid = 1 / (1 + exp(-h)); approx
    # reciprocal runs on the EUP slot (free alongside VALU / MXU work).
    h = h * pl.reciprocal(1.0 + jnp.exp(-h), approx=True)
    # Second linear: h @ Wo + bo  (round h to the weight dtype for the MXU).
    o = jnp.dot(h.astype(wo_ref.dtype), wo_ref[...],
                preferred_element_type=jnp.float32)
    o = o + bo_ref[...]
    o_ref[...] = o.astype(o_ref.dtype)


def _pick_block_b(batch, itemsize):
    """Batch tile: multiple of the sublane packing, >= 2 grid steps if possible."""
    sub = 16 if itemsize == 2 else 8
    if batch % sub != 0:
        return batch                     # ragged tiny batch: one tile, still correct
    best = None
    for blk in (1024, 512, 256, 128, 64, 32, 16, 8):
        if blk % sub or blk > batch or batch % blk:
            continue
        if best is None:
            best = blk
        if batch // blk >= 2:            # pipelining + v7x megacore sharding
            return blk
    return best if best is not None else batch


def _vmem_limit_bytes(block_b, in_dim, dim, x_dtype, w_dtype, out_dtype):
    isz = lambda dt: jnp.dtype(dt).itemsize
    x_tiles = 2 * block_b * in_dim * isz(x_dtype)        # double-buffered x tile
    o_tiles = 2 * block_b * dim * isz(out_dtype)         # double-buffered out tile
    weights = (in_dim * dim + dim * dim) * isz(w_dtype)  # single-buffered, resident
    biases = 2 * 2 * dim * 4
    interm = 2 * block_b * dim * 4                       # f32 h / o intermediates
    est = int((x_tiles + o_tiles + weights + biases + interm) * 1.5) + (2 << 20)
    # Cap at 64 MiB so the request is valid on every generation (v7x VMEM/TC).
    return int(min(max(est, 16 << 20), 64 << 20))


def mlp_embedder(x, wi, bi, wo, bo, *, block_b=None):
    """x: [B, in_dim]; wi: [in_dim, dim]; bi: [dim]; wo: [dim, dim]; bo: [dim].

    Weights are stored pre-transposed relative to torch.nn.Linear's (out, in)
    layout so the kernel computes row-major x @ W matmuls on the MXU.
    """
    B, in_dim = x.shape
    dim = wi.shape[1]
    out_dtype = x.dtype

    if block_b is None:
        block_b = _pick_block_b(B, jnp.dtype(x.dtype).itemsize)
    assert B % block_b == 0, (B, block_b)

    bi2 = bi.reshape(1, dim).astype(jnp.float32)
    bo2 = bo.reshape(1, dim).astype(jnp.float32)

    grid = (B // block_b,)

    # Advisory cost estimate so XLA can overlap the weight DMA with neighbors.
    flops = 2 * B * dim * (in_dim + dim) + 3 * B * dim
    bytes_accessed = (x.size * x.dtype.itemsize
                      + wi.size * wi.dtype.itemsize
                      + wo.size * wo.dtype.itemsize
                      + (bi2.size + bo2.size) * 4
                      + B * dim * jnp.dtype(out_dtype).itemsize)
    cost = pl.CostEstimate(flops=flops, transcendentals=B * dim,
                           bytes_accessed=bytes_accessed)

    # Constant-index (resident) blocks: single-buffer, no perf loss (fetched once).
    resident = functools.partial(pl.BlockSpec, pipeline_mode=pl.Buffered(1))

    return pl.pallas_call(
        _mlp_embedder_kernel,
        out_shape=jax.ShapeDtypeStruct((B, dim), out_dtype),
        grid_spec=pltpu.PrefetchScalarGridSpec(
            num_scalar_prefetch=0,
            grid=grid,
            in_specs=[
                pl.BlockSpec((block_b, in_dim), lambda i: (i, 0)),   # x tile
                resident((in_dim, dim), lambda i: (0, 0)),           # Wi (resident)
                pl.BlockSpec((1, dim), lambda i: (0, 0)),            # bi (full-dim)
                resident((dim, dim), lambda i: (0, 0)),              # Wo (resident)
                pl.BlockSpec((1, dim), lambda i: (0, 0)),            # bo (full-dim)
            ],
            out_specs=pl.BlockSpec((block_b, dim), lambda i: (i, 0)),
        ),
        compiler_params=pltpu.CompilerParams(
            dimension_semantics=("parallel",),
            vmem_limit_bytes=_vmem_limit_bytes(
                block_b, in_dim, dim, x.dtype, wi.dtype, out_dtype),
        ),
        cost_estimate=cost,
    )(x, wi, bi2, wo, bo2)


if __name__ == "__main__":
    # Small demo shapes for the time-vector embedder, chosen lane-dense
    # (feature dims multiple of 128) and with >= 2 batch tiles.
    B, in_dim, dim = 64, 128, 256

    key = jax.random.PRNGKey(0)
    k_x, k_wi, k_bi, k_wo, k_bo = jax.random.split(key, 5)

    # Compute-path dtypes: x & weights in bf16, biases in f32 (added after the
    # f32 MXU accumulation inside the kernel).
    x = jax.random.normal(k_x, (B, in_dim), dtype=jnp.float32).astype(jnp.bfloat16)
    wi = (jax.random.normal(k_wi, (in_dim, dim), jnp.float32) * 0.02).astype(jnp.bfloat16)
    bi = jax.random.normal(k_bi, (dim,), jnp.float32) * 0.02
    wo = (jax.random.normal(k_wo, (dim, dim), jnp.float32) * 0.02).astype(jnp.bfloat16)
    bo = jax.random.normal(k_bo, (dim,), jnp.float32) * 0.02

    out = mlp_embedder(x, wi, bi, wo, bo)
    out = jax.block_until_ready(out)

    # Pure-JAX reference of the PyTorch forward wo(silu(wi(x))), computed in
    # f32 on the same bf16-quantized inputs.
    xf = x.astype(jnp.float32)
    wif = wi.astype(jnp.float32)
    wof = wo.astype(jnp.float32)
    h_ref = xf @ wif + bi
    h_ref = h_ref * jax.nn.sigmoid(h_ref)
    ref = h_ref @ wof + bo

    assert out.shape == (B, dim)
    err = float(jnp.max(jnp.abs(out.astype(jnp.float32) - ref)))
    assert err < 2e-2, f"max abs err {err}"
    print("KERNEL_OK")
</pallas_src>

<mosaic_0001>
module attributes {stable_mosaic.version = 11 : i64} {
  func.func @_mlp_embedder_kernel(%arg0: i32, %arg1: memref<32x128xbf16, #tpu.memory_space<vmem>>, %arg2: memref<128x256xbf16, #tpu.memory_space<vmem>>, %arg3: memref<1x256xf32, #tpu.memory_space<vmem>>, %arg4: memref<256x256xbf16, #tpu.memory_space<vmem>>, %arg5: memref<1x256xf32, #tpu.memory_space<vmem>>, %arg6: memref<32x256xbf16, #tpu.memory_space<vmem>>) attributes {dimension_semantics = [#tpu.dimension_semantics<parallel>], iteration_bounds = array<i64: 2>, scalar_prefetch = 0 : i64, scratch_operands = 0 : i64, tpu.core_type = #tpu.core_type<tc>, window_params = [{transform_indices = @transform_0, window_bounds = array<i64: 32, 128>}, {pipeline_mode = #tpu.pipeline_mode<synchronous>, transform_indices = @transform_1, window_bounds = array<i64: 128, 256>}, {pipeline_mode = #tpu.pipeline_mode<synchronous>, transform_indices = @transform_2, window_bounds = array<i64: 1, 256>}, {pipeline_mode = #tpu.pipeline_mode<synchronous>, transform_indices = @transform_3, window_bounds = array<i64: 256, 256>}, {pipeline_mode = #tpu.pipeline_mode<synchronous>, transform_indices = @transform_4, window_bounds = array<i64: 1, 256>}, {transform_indices = @transform_5, window_bounds = array<i64: 32, 256>}]} {
    %c0 = arith.constant 0 : index
    %c0_0 = arith.constant 0 : index
    %0 = vector.load %arg1[%c0, %c0_0] : memref<32x128xbf16, #tpu.memory_space<vmem>>, vector<32x128xbf16>
    %c0_1 = arith.constant 0 : index
    %c0_2 = arith.constant 0 : index
    %1 = vector.load %arg2[%c0_1, %c0_2] : memref<128x256xbf16, #tpu.memory_space<vmem>>, vector<128x256xbf16>
    %cst = arith.constant dense<0.000000e+00> : vector<32x256xf32>
    %2 = tpu.matmul %0, %1, %cst {dimension_numbers = #tpu.dot_dimension_numbers<[1], [0], [0], [1], [0, 0, 1, 1], [], []>} : vector<32x128xbf16>, vector<128x256xbf16>, vector<32x256xf32> -> vector<32x256xf32>
    %c0_3 = arith.constant 0 : index
    %c0_4 = arith.constant 0 : index
    %3 = vector.load %arg3[%c0_3, %c0_4] : memref<1x256xf32, #tpu.memory_space<vmem>>, vector<1x256xf32>
    %4 = vector.broadcast %3 : vector<1x256xf32> to vector<32x256xf32>
    %5 = arith.addf %2, %4 : vector<32x256xf32>
    %cst_5 = arith.constant 0.000000e+00 : f32
    %6 = vector.broadcast %cst_5 : f32 to vector<32x256xf32>
    %7 = arith.subf %6, %5 : vector<32x256xf32>
    %8 = math.exp %7 : vector<32x256xf32>
    %cst_6 = arith.constant 1.000000e+00 : f32
    %9 = vector.broadcast %cst_6 : f32 to vector<32x256xf32>
    %10 = arith.addf %9, %8 : vector<32x256xf32>
    %11 = tpu.reciprocal %10 {approx = true} : vector<32x256xf32> -> vector<32x256xf32>
    %12 = arith.mulf %5, %11 : vector<32x256xf32>
    %13 = arith.truncf %12 : vector<32x256xf32> to vector<32x256xbf16>
    %c0_7 = arith.constant 0 : index
    %c0_8 = arith.constant 0 : index
    %14 = vector.load %arg4[%c0_7, %c0_8] : memref<256x256xbf16, #tpu.memory_space<vmem>>, vector<256x256xbf16>
    %cst_9 = arith.constant dense<0.000000e+00> : vector<32x256xf32>
    %15 = tpu.matmul %13, %14, %cst_9 {dimension_numbers = #tpu.dot_dimension_numbers<[1], [0], [0], [1], [0, 0, 1, 1], [], []>} : vector<32x256xbf16>, vector<256x256xbf16>, vector<32x256xf32> -> vector<32x256xf32>
    %c0_10 = arith.constant 0 : index
    %c0_11 = arith.constant 0 : index
    %16 = vector.load %arg5[%c0_10, %c0_11] : memref<1x256xf32, #tpu.memory_space<vmem>>, vector<1x256xf32>
    %17 = vector.broadcast %16 : vector<1x256xf32> to vector<32x256xf32>
    %18 = arith.addf %15, %17 : vector<32x256xf32>
    %19 = arith.truncf %18 : vector<32x256xf32> to vector<32x256xbf16>
    %c0_12 = arith.constant 0 : index
    %c0_13 = arith.constant 0 : index
    %20 = vector.load %arg6[%c0_12, %c0_13] : memref<32x256xbf16, #tpu.memory_space<vmem>>, vector<32x256xbf16>
    tpu.vector_store %arg6[%c0_12, %c0_13], %19 {strides = array<i32>} : memref<32x256xbf16, #tpu.memory_space<vmem>>, vector<32x256xbf16>,
    return
  }
  func.func @transform_0(%arg0: i32) -> (i32, i32) {
    %c0_i32 = arith.constant 0 : i32
    %c0_i32_0 = arith.constant 0 : i32
    return %arg0, %c0_i32 : i32, i32
  }
  func.func @transform_1(%arg0: i32) -> (i32, i32) {
    %c0_i32 = arith.constant 0 : i32
    %c0_i32_0 = arith.constant 0 : i32
    %c0_i32_1 = arith.constant 0 : i32
    return %c0_i32, %c0_i32_0 : i32, i32
  }
  func.func @transform_2(%arg0: i32) -> (i32, i32) {
    %c0_i32 = arith.constant 0 : i32
    %c0_i32_0 = arith.constant 0 : i32
    %c0_i32_1 = arith.constant 0 : i32
    return %c0_i32, %c0_i32_0 : i32, i32
  }
  func.func @transform_3(%arg0: i32) -> (i32, i32) {
    %c0_i32 = arith.constant 0 : i32
    %c0_i32_0 = arith.constant 0 : i32
    %c0_i32_1 = arith.constant 0 : i32
    return %c0_i32, %c0_i32_0 : i32, i32
  }
  func.func @transform_4(%arg0: i32) -> (i32, i32) {
    %c0_i32 = arith.constant 0 : i32
    %c0_i32_0 = arith.constant 0 : i32
    %c0_i32_1 = arith.constant 0 : i32
    return %c0_i32, %c0_i32_0 : i32, i32
  }
  func.func @transform_5(%arg0: i32) -> (i32, i32) {
    %c0_i32 = arith.constant 0 : i32
    %c0_i32_0 = arith.constant 0 : i32
    return %arg0, %c0_i32 : i32, i32
  }
}

</mosaic_0001>

<bundles_post_ra>
// kernel: tpu_custom_call.1
= control target key start
LH: loop header
LB: loop body
LE: loop exit
PB: predicated region body
PF: predicated region fallthrough
CT: control target
= control target key end

     0   :  { %10 = vsyncpa [#allocation3], 0  ;;  %s1624_s0 = inlined_call_operand.hbm [shape: bf16[64,128], index: 0, kind: input, shape index: {}]   ;;  %s1625_s1 = inlined_call_operand.hbm [shape: bf16[128,256], index: 1, kind: input, shape index: {}]   ;;  %s1626_s2 = inlined_call_operand.vmem [shape: f32[1,256], index: 2, kind: input, shape index: {}]   ;;  %s1627_s3 = inlined_call_operand.hbm [shape: bf16[256,256], index: 3, kind: input, shape index: {}]   ;;  %s1628_s4 = inlined_call_operand.vmem [shape: f32[1,256], index: 4, kind: input, shape index: {}]   ;;  %s1629_s5 = inlined_call_operand.hbm [shape: bf16[64,256], index: 5, kind: output, shape index: {}]  }
   0x1   :  { %12 = vsyncpa [#allocation3 + $0x1], 0 }
   0x2   :  { %13 = vsyncpa [#allocation6], 0 }
   0x3   :  { %14 = vsyncpa [#allocation4], 0 }
   0x4   :  { %16 = vsyncpa [#allocation4 + $0x1], 0  ;;  %s1355_s18 = smov 0   ;;  %s1357_s19 = smov 0  }
   0x5   :  { %s1359_s20 = smov 0   ;;  %s1361_s21 = smov 0  }
   0x6 LB: > { %s1376_s22 = sadd.s32 4294967295, %s1312_s21   ;;  %s896_s23 = sadd.s32 4294967294, %s1312_s21   ;;  %s1312_s21 = sphi %s1361_s21, %s1649_s21   ;;  %s1308_s20 = sphi %s1359_s20, %s1648_s20   ;;  %s1304_s19 = sphi %s1357_s19, %s1647_s19   ;;  %s1300_s18 = sphi %s1355_s18, %s1646_s18  }
   0x7   : > { %p42_p0 = scmp.ne.s32.totalorder %s1304_s19, %s1300_s18  ;;  %p1630_p1 = scmp.eq.s32.totalorder %s1376_s22, 0 }
   0x8   : > { %p156_p3 = scmp.eq.s32.totalorder %s896_s23, 1  ;;  %p897_p5 = scmp.ge.s32.totalorder %s1312_s21, 1 }
   0x9   : > { %p1385_p4 = por %p1630_p1, %p42_p0  ;;  %p163_p7 = scmp.lt.s32.totalorder %s1312_s21, 3 }
   0xa   : > { %p1390_p6 = por %p156_p3, %p42_p0  ;;  %s1314_s27 = smov [#allocation5]  }
   0xb   : > { %s1633_s24 = scalar_select %p1385_p4, 1, 0 }
   0xc   : > { %s1634_s25 = scalar_select %p1390_p6, 1, 0 }
   0xd   : > { %p1395_p8 = pnand %p897_p5, %p163_p7  ;;  %s175_s28 = sshll.u32 %s1314_s27, 4  ;;  %s1399_s28 = int_to_ptr.vmem [resolvable:$true] %s175_s28 }
   0xe   : > { %s1315_s30 = smov [#allocation7]   ;;  %s1156_s9 = scalar_lea.hbm %s1625_s1, 2048 }
   0xf   : > { %p988_p9 = pneg %p1395_p8  ;;  %s191_s6 = sshll.u32 %s1315_s30, 4  ;;  %s1410_s6 = int_to_ptr.vmem [resolvable:$true] %s191_s6 }
  0x10   : > { %p1157_p12 = scmp.ne.s32.totalorder %s1625_s1, %s1156_s9  ;;  %p1163_p5 = scmp.lt.u32.totalorder %s1156_s9, %s1625_s1 }
  0x11   : > { %p1406_p11 = pnand %p988_p9, %p1630_p1 }
  0x13   : > { %p1158_p13 = pneg %p1406_p11 }
  0x15   : > { %p1159_p0 = pnand %p1158_p13, %p1157_p12 }
  0x17   : > { %p1160_p3 = pneg %p1159_p0 }
  0x19   : > { %p1165_p7 = pnand %p1163_p5, %p1160_p3 }
  0x1b   : > { %1168 = shalt.err (!%p1165_p7)
}
  0x1c   : > { %s1169_s14 = scalar_lea.vmem %s1399_s28, 2048  ;;  %p1177_p2 = scmp.lt.s32.totalorder %s1399_s28, %s1399_s28 }
  0x1d   : > { %p1170_p9 = scmp.ne.s32.totalorder %s1399_s28, %s1169_s14  ;;  %p1178_p12 = scmp.lt.s32.totalorder %s1169_s14, %s1169_s14 }
  0x1f   : > { %p1172_p10 = pnand %p1170_p9, %p1158_p13  ;;  %p1179_p0 = por %p1178_p12, %p1177_p2 }
  0x21   : > { %p1173_p1 = pneg %p1172_p10 }
  0x23   : > { %p1180_p6 = pnand %p1179_p0, %p1173_p1 }
  0x25   : > { %1183 = shalt.err (!%p1180_p6)
}
  0x26   : > { %s1316_s15 = smov 128   ;;  %s1317_s16 = smov 8  }
  0x27   : > { %991 = dma.hbm_to_vmem [thread:$0]  (!%p1406_p11), %s1625_s1, 2048, %s1399_s28, [#allocation6], %s1316_s15, %s1316_s15, %s1317_s16  }
  0x28   : > { %s1184_s7 = scalar_lea.hbm %s1627_s3, 4096 }
  0x29   : > { %p1185_p2 = scmp.ne.s32.totalorder %s1627_s3, %s1184_s7  ;;  %p1191_p10 = scmp.lt.u32.totalorder %s1184_s7, %s1627_s3 }
  0x2b   : > { %p1187_p1 = pnand %p1185_p2, %p1158_p13 }
  0x2d   : > { %p1188_p6 = pneg %p1187_p1 }
  0x2f   : > { %p1193_p3 = pnand %p1191_p10, %p1188_p6 }
  0x31   : > { %1196 = shalt.err (!%p1193_p3)
}
  0x32   : > { %s1197_s28 = scalar_lea.vmem %s1410_s6, 4096  ;;  %p1205_p12 = scmp.lt.s32.totalorder %s1410_s6, %s1410_s6 }
  0x33   : > { %p1198_p5 = scmp.ne.s32.totalorder %s1410_s6, %s1197_s28  ;;  %p1206_p0 = scmp.lt.s32.totalorder %s1197_s28, %s1197_s28 }
  0x35   : > { %p1200_p7 = pnand %p1198_p5, %p1158_p13  ;;  %p1207_p2 = por %p1206_p0, %p1205_p12 }
  0x37   : > { %p1201_p9 = pneg %p1200_p7 }
  0x39   : > { %p1208_p1 = pnand %p1207_p2, %p1201_p9 }
  0x3b   : > { %1211 = shalt.err (!%p1208_p1)
}
  0x3c   : > { %994 = dma.hbm_to_vmem [thread:$0]  (!%p1406_p11), %s1627_s3, 4096, %s1410_s6, [#allocation6], %s1316_s15, %s1316_s15, %s1317_s16  }
  0x3d   : > { %s1465_s14 = sadd.s32 1, %s1312_s21   ;;  %s29_s29 = sadd.s32 1, %s1308_s20 }
  0x3e   : > { %s26_s17 = ssub.s32 %s1312_s21, %s1465_s14  ;;  %p36_p13 = scmp.ne.s32.totalorder %s1308_s20, %s1304_s19 }
  0x3f   : > { %p27_p6 = scmp.eq.s32.totalorder %s26_s17, 0  ;;  %p37_p10 = scmp.eq.s32.totalorder %s1312_s21, 0 }
  0x40   : > { %p1637_p3 = scmp.eq.s32.totalorder %s1376_s22, 1  ;;  %p1005_p7 = scmp.lt.s32.totalorder %s1312_s21, 2 }
  0x41   : > { %s1481_s27 = scalar_select %p27_p6, %s1308_s20, %s29_s29  }
  0x42   : > { %p1475_p5 = por %p1637_p3, %p36_p13  ;;  %p38_p9 = por %p37_p10, %p36_p13 }
  0x43   : > { %s208_s30 = sand.u32 1, %s1308_s20   ;;  %s969_s6 = sshll.u32 %s1312_s21, 8 }
  0x44   : > { %s1638_s23 = scalar_select %p1475_p5, 1, 0 }
  0x45   : > { %s901_s7 = sshll.u32 %s208_s30, 4  ;;  %s1488_s8 = scalar_lea.hbm %s1624_s0, %s969_s6 }
  0x46   : > { %s212_s9 = scalar_lea.vmem [#allocation2], %s901_s7  ;;  %p1492_p11 = pnand %p1005_p7, %p38_p9 }
  0x47   : > { %s219_s10 = sshll.u32 %s212_s9, 4  ;;  %s1496_s28 = scalar_lea.sflag [#allocation3], %s208_s30  ;;  %s1490_s10 = int_to_ptr.vmem [resolvable:$true] %s219_s10 }
  0x48   : > { %s1212_s12 = scalar_lea.hbm %s1488_s8, 256  ;;  %p1214_p0 = pneg %p1492_p11 }
  0x49   : > { %p1213_p12 = scmp.ne.s32.totalorder %s1488_s8, %s1212_s12  ;;  %s1217_s17 = scalar_lea.hbm %s1624_s0, 512 }
  0x4a   : > { %p1218_p13 = scmp.lt.u32.totalorder %s1488_s8, %s1624_s0  ;;  %p1219_p6 = scmp.lt.u32.totalorder %s1217_s17, %s1212_s12 }
  0x4b   : > { %p1215_p2 = pnand %p1214_p0, %p1213_p12  ;;  %p1221_p3 = scmp.lt.u32.totalorder %s1212_s12, %s1488_s8 }
  0x4c   : > { %p1220_p10 = por %p1219_p6, %p1218_p13 }
  0x4d   : > { %p1216_p1 = pneg %p1215_p2 }
  0x4e   : > { %p1222_p7 = por %p1221_p3, %p1220_p10 }
  0x50   : > { %p1223_p9 = pnand %p1222_p7, %p1216_p1 }
  0x52   : > { %1226 = shalt.err (!%p1223_p9)
}
  0x53   : > { %s1227_s30 = scalar_lea.vmem %s1490_s10, 256  ;;  %s1318_s15 = smov [#allocation2]  }
  0x54   : > { %p1228_p12 = scmp.ne.s32.totalorder %s1490_s10, %s1227_s30  ;;  %s1232_s16 = sshll.u32 %s1318_s15, 4  ;;  %s1233_s16 = int_to_ptr.vmem [resolvable:$false] %s1232_s16 }
  0x55   : > { %s1234_s9 = scalar_lea.vmem %s1233_s16, 512  ;;  %p1235_p4 = scmp.lt.s32.totalorder %s1490_s10, %s1233_s16 }
  0x56   : > { %p1230_p2 = pnand %p1228_p12, %p1214_p0  ;;  %p1236_p13 = scmp.lt.s32.totalorder %s1234_s9, %s1227_s30 }
  0x58   : > { %p1231_p5 = pneg %p1230_p2  ;;  %p1237_p6 = por %p1236_p13, %p1235_p4 }
  0x5a   : > { %p1238_p10 = pnand %p1237_p6, %p1231_p5 }
  0x5c   : > { %1241 = shalt.err (!%p1238_p10)
}
  0x5d   : > { %s1319_s12 = smov 64   ;;  %s1320_s13 = smov 4  }
  0x5e   : > { %998 = dma.hbm_to_vmem [thread:$0]  (!%p1492_p11), %s1488_s8, 256, %s1490_s10, %s1496_s28, %s1319_s12, %s1319_s12, %s1320_s13  }
  0x5f   : > { %231 = sbr.rel (%p1395_p8) target bundleno = 631 (0x277), region = 40  ;;  %s1527_s29 = sand.u32 (!%p1395_p8), 1, %s1304_s19  }
  0x60   : > { %s905_s17 = sshll.u32 (!%p1395_p8), %s1527_s29, 4  ;;  %s234_s7 = scalar_lea.sflag (!%p1395_p8), [#allocation3], %s1527_s29 }
  0x61   : > { %s1531_s6 = scalar_lea.vmem (!%p1395_p8), [#allocation2], %s905_s17  ;;  %p1640_p4 = scmp.ne.s32.totalorder (!%p1395_p8), %s1633_s24, 0 }
  0x66   : > { %1287 = dma.done.wait (%p1640_p4), %s234_s7, 256  }
  0x67   : > { %1289 = vsyncadd (%p1640_p4), %s234_s7, 4294967040  ;;  %p1641_p5 = scmp.eq.s32.totalorder %s1376_s22, 0 }
  0x69   : > { %1291 = dma.done.wait (%p1641_p5), [#allocation6], 6144   ;;  %p1642_p8 = pmov %p1641_p5 }
  0x6a   : > { %v1321_v0 = vmov 0   ;;  %v1050_v1 = vld [vmem:[#allocation5 + $0x4] ss:$8 sps:$4 sm:$0xff]   ;;  %v1052_v2 = vld [vmem:[#allocation5] ss:$8 sps:$4 sm:$0xff]   ;;  %v297_v51 = vlaneseq  ;;  %s908_s11 = sshll.u32 %s1527_s29, 5 }
  0x6b   : > { %1293 = vsyncadd (%p1642_p8), [#allocation6], 4294961152  ;;  %431 = vmatprep.mubr.bf16.mxu0 %v1321_v0  ;;  %399 = vmatprep.subr.bf16.mxu0 %v1050_v1  ;;  %v1053_v3 = vld [vmem:[#allocation5 + $0x14] ss:$8 sps:$4 sm:$0xff]   ;;  %v1055_v4 = vld [vmem:[#allocation5 + $0x10] ss:$8 sps:$4 sm:$0xff]  }
  0x6c   : > { %400 = vmatpush1.bf16.msra.mxu0 %v1052_v2  ;;  %v1056_v5 = vld [vmem:[#allocation5 + $0x24] ss:$8 sps:$4 sm:$0xff]   ;;  %v1058_v6 = vld [vmem:[#allocation5 + $0x20] ss:$8 sps:$4 sm:$0xff]   ;;  %v1059_v7 = vld [vmem:[#allocation5 + $0x34] ss:$8 sps:$4 sm:$0xff]  }
  0x6d   : > { %401 = vmatprep.subr.bf16.mxu0 %v1053_v3  ;;  %v1061_v8 = vld [vmem:[#allocation5 + $0x30] ss:$8 sps:$4 sm:$0xff]   ;;  %v1062_v9 = vld [vmem:[#allocation5 + $0x44] ss:$8 sps:$4 sm:$0xff]   ;;  %v1078_v11 = vld [vmem:[#allocation7] ss:$8 sps:$4 sm:$0xff]  }
  0x6e   : > { %v1076_v10 = vld [vmem:[#allocation7 + $0x4] ss:$8 sps:$4 sm:$0xff]   ;;  %v1079_v12 = vld [vmem:[#allocation7 + $0x14] ss:$8 sps:$4 sm:$0xff]   ;;  %v1064_v13 = vld [vmem:[#allocation5 + $0x40] ss:$8 sps:$4 sm:$0xff]  }
  0x6f   : > { %708 = vmatprep.subr.bf16.mxu1 %v1076_v10  ;;  %v1065_v14 = vld [vmem:[#allocation5 + $0x54] ss:$8 sps:$4 sm:$0xff]   ;;  %v1081_v15 = vld [vmem:[#allocation7 + $0x10] ss:$8 sps:$4 sm:$0xff]   ;;  %v1082_v16 = vld [vmem:[#allocation7 + $0x24] ss:$8 sps:$4 sm:$0xff]  }
  0x70   : > { %402 = vmatpush1.bf16.msra.mxu0 %v1055_v4  ;;  %709 = vmatpush1.bf16.msra.mxu1 %v1078_v11  ;;  %v1067_v17 = vld [vmem:[#allocation5 + $0x50] ss:$8 sps:$4 sm:$0xff]   ;;  %v1068_v18 = vld [vmem:[#allocation5 + $0x64] ss:$8 sps:$4 sm:$0xff]   ;;  %v1084_v19 = vld [vmem:[#allocation7 + $0x20] ss:$8 sps:$4 sm:$0xff]  }
  0x71   : > { %403 = vmatprep.subr.bf16.mxu0 %v1056_v5  ;;  %710 = vmatprep.subr.bf16.mxu1 %v1079_v12  ;;  %v1070_v20 = vld [vmem:[#allocation5 + $0x60] ss:$8 sps:$4 sm:$0xff]   ;;  %v1085_v21 = vld [vmem:[#allocation7 + $0x34] ss:$8 sps:$4 sm:$0xff]   ;;  %v1087_v23 = vld [vmem:[#allocation7 + $0x30] ss:$8 sps:$4 sm:$0xff]  }
  0x72   : > { %v1071_v22 = vld [vmem:[#allocation5 + $0x74] ss:$8 sps:$4 sm:$0xff]   ;;  %v1088_v24 = vld [vmem:[#allocation7 + $0x44] ss:$8 sps:$4 sm:$0xff]   ;;  %v1073_v25 = vld [vmem:[#allocation5 + $0x70] ss:$8 sps:$4 sm:$0xff]  }
  0x73   : > { %v1090_v26 = vld [vmem:[#allocation7 + $0x40] ss:$8 sps:$4 sm:$0xff]   ;;  %v1091_v27 = vld [vmem:[#allocation7 + $0x54] ss:$8 sps:$4 sm:$0xff]   ;;  %v1093_v29 = vld [vmem:[#allocation7 + $0x50] ss:$8 sps:$4 sm:$0xff]  }
  0x74   : > { %404 = vmatpush1.bf16.msra.mxu0 %v1058_v6  ;;  %711 = vmatpush1.bf16.msra.mxu1 %v1081_v15  ;;  %v1074_v28 = vld [vmem:[%s1531_s6] sm:$0xff]   ;;  %v1075_v31 = vld [vmem:[%s1531_s6 + $0x8] sm:$0xff]   ;;  %v1543_v52 = vshrl.u32 %v297_v51, 7  ;;  %s271_s28 = scalar_lea.vmem [#allocation8], %s908_s11  ;;  %s975_s15 = sshll.u32 %s1376_s22, 9 }
  0x75   : > { %405 = vmatprep.subr.bf16.mxu0 %v1059_v7  ;;  %712 = vmatprep.subr.bf16.mxu1 %v1082_v16  ;;  %v1094_v30 = vld [vmem:[#allocation7 + $0x64] ss:$8 sps:$4 sm:$0xff]   ;;  %v1096_v32 = vld [vmem:[#allocation7 + $0x60] ss:$8 sps:$4 sm:$0xff]   ;;  %v1097_v33 = vld [vmem:[#allocation7 + $0x74] ss:$8 sps:$4 sm:$0xff]   ;;  %s1580_s12 = scalar_lea.hbm %s1629_s5, %s975_s15 }
  0x76   : > { %v1099_v34 = vld [vmem:[#allocation7 + $0x70] ss:$8 sps:$4 sm:$0xff]   ;;  %v1100_v35 = vld [vmem:[#allocation7 + $0x84] ss:$8 sps:$4 sm:$0xff]   ;;  %v1102_v36 = vld [vmem:[#allocation7 + $0x80] ss:$8 sps:$4 sm:$0xff]  }
  0x77   : > { %v1103_v37 = vld [vmem:[#allocation7 + $0x94] ss:$8 sps:$4 sm:$0xff]   ;;  %v1105_v38 = vld [vmem:[#allocation7 + $0x90] ss:$8 sps:$4 sm:$0xff]   ;;  %v1106_v39 = vld [vmem:[#allocation7 + $0xa4] ss:$8 sps:$4 sm:$0xff]  }
  0x78   : > { %406 = vmatpush1.bf16.msra.mxu0 %v1061_v8  ;;  %713 = vmatpush1.bf16.msra.mxu1 %v1084_v19  ;;  %v1108_v40 = vld [vmem:[#allocation7 + $0xa0] ss:$8 sps:$4 sm:$0xff]   ;;  %v1109_v41 = vld [vmem:[#allocation7 + $0xb4] ss:$8 sps:$4 sm:$0xff]   ;;  %v1111_v42 = vld [vmem:[#allocation7 + $0xb0] ss:$8 sps:$4 sm:$0xff]  }
  0x79   : > { %407 = vmatprep.subr.bf16.mxu0 %v1062_v9  ;;  %714 = vmatprep.subr.bf16.mxu1 %v1085_v21  ;;  %v1112_v43 = vld [vmem:[#allocation7 + $0xc4] ss:$8 sps:$4 sm:$0xff]   ;;  %v1114_v44 = vld [vmem:[#allocation7 + $0xc0] ss:$8 sps:$4 sm:$0xff]   ;;  %v1115_v45 = vld [vmem:[#allocation7 + $0xd4] ss:$8 sps:$4 sm:$0xff]  }
  0x7a   : > { %v1117_v46 = vld [vmem:[#allocation7 + $0xd0] ss:$8 sps:$4 sm:$0xff]   ;;  %v1118_v47 = vld [vmem:[#allocation7 + $0xe4] ss:$8 sps:$4 sm:$0xff]   ;;  %v1120_v48 = vld [vmem:[#allocation7 + $0xe0] ss:$8 sps:$4 sm:$0xff]  }
  0x7b   : > { %v1121_v49 = vld [vmem:[#allocation7 + $0xf4] ss:$8 sps:$4 sm:$0xff]   ;;  %v1123_v50 = vld [vmem:[#allocation7 + $0xf0] ss:$8 sps:$4 sm:$0xff]   ;;  %v299_v53 = vsub.s32 0, %v1543_v52  ;;  %v303_v55 = vsub.s32 1, %v1543_v52 }
  0x7c   : > { %408 = vmatpush1.bf16.msra.mxu0 %v1064_v13  ;;  %715 = vmatpush1.bf16.msra.mxu1 %v1087_v23  ;;  %v295_v54 = vld [vmem:[%s1626_s2] sm:$0x3]  ;;  %s804_s30 = sshll.u32 %s271_s28, 4  ;;  %s790_s13 = scalar_lea.sflag [#allocation4], %s1527_s29  ;;  %s1575_s30 = int_to_ptr.vmem [resolvable:$true] %s804_s30 }
  0x7d   : > { %409 = vmatprep.subr.bf16.mxu0 %v1065_v14  ;;  %716 = vmatprep.subr.bf16.mxu1 %v1088_v24  ;;  %v300_v56 = vrot.slane %v295_v54, %v299_v53  ;;  %v304_v57 = vrot.slane %v295_v54, %v303_v55  ;;  %s1242_s17 = scalar_lea.vmem %s1575_s30, 512  ;;  %p1643_p0 = scmp.ne.s32.totalorder %s1638_s23, 0 }
  0x7e   : > { %p1243_p11 = scmp.ne.s32.totalorder %s1575_s30, %s1242_s17  ;;  %s1322_s22 = smov [#allocation8]  }
  0x7f   : > { %s1246_s7 = sshll.u32 %s1322_s22, 4  ;;  %s1247_s7 = int_to_ptr.vmem [resolvable:$false] %s1246_s7 }
  0x80   : > { %410 = vmatpush1.bf16.msra.mxu0 %v1067_v17  ;;  %717 = vmatpush1.bf16.msra.mxu1 %v1090_v26  ;;  %p1244_p1 = pnand %p1243_p11, %p1643_p0  ;;  %s1248_s6 = scalar_lea.vmem %s1247_s7, 1024 }
  0x81   : > { %411 = vmatprep.subr.bf16.mxu0 %v1068_v18  ;;  %718 = vmatprep.subr.bf16.mxu1 %v1091_v27  ;;  %p1249_p7 = scmp.lt.s32.totalorder %s1575_s30, %s1247_s7  ;;  %p1250_p9 = scmp.lt.s32.totalorder %s1248_s6, %s1242_s17 }
  0x82   : > { %p1245_p3 = pneg %p1244_p1 }
  0x83   : > { %p1251_p12 = por %p1250_p9, %p1249_p7 }
  0x84   : > { %412 = vmatpush1.bf16.msra.mxu0 %v1070_v20  ;;  %719 = vmatpush1.bf16.msra.mxu1 %v1093_v29 }
  0x85   : > { %413 = vmatprep.subr.bf16.mxu0 %v1071_v22  ;;  %720 = vmatprep.subr.bf16.mxu1 %v1094_v30  ;;  %p1252_p2 = pnand %p1251_p12, %p1245_p3 }
  0x88   : > { %414 = vmatpush1.bf16.msra.mxu0 %v1073_v25  ;;  %721 = vmatpush1.bf16.msra.mxu1 %v1096_v32 }
  0x89   : > { %722 = vmatprep.subr.bf16.mxu1 %v1097_v33 }
  0x8b   : > { %432 = vmatmul.mubr.bf16.vlgmr.msra.gmra.mrb[0].mxu0 %v1074_v28 }
  0x8c   : > { %441 = vmatprep.mubr.bf16.mxu0 %v1321_v0  ;;  %723 = vmatpush1.bf16.msra.mxu1 %v1099_v34 }
  0x8d   : > { %724 = vmatprep.subr.bf16.mxu1 %v1100_v35 }
  0x90   : > { %725 = vmatpush1.bf16.msra.mxu1 %v1102_v36 }
  0x91   : > { %726 = vmatprep.subr.bf16.mxu1 %v1103_v37 }
  0x93   : > { %442 = vmatmul.mubr.bf16.gmra.mrb[4].mxu0 %v1075_v31 }
  0x94   : > { %727 = vmatpush1.bf16.msra.mxu1 %v1105_v38 }
  0x95   : > { %728 = vmatprep.subr.bf16.mxu1 %v1106_v39 }
  0x98   : > { %729 = vmatpush1.bf16.msra.mxu1 %v1108_v40 }
  0x99   : > { %730 = vmatprep.subr.bf16.mxu1 %v1109_v41 }
  0x9c   : > { %731 = vmatpush1.bf16.msra.mxu1 %v1111_v42 }
  0x9d   : > { %732 = vmatprep.subr.bf16.mxu1 %v1112_v43 }
  0xa0   : > { %733 = vmatpush1.bf16.msra.mxu1 %v1114_v44 }
  0xa1   : > { %734 = vmatprep.subr.bf16.mxu1 %v1115_v45 }
  0xa4   : > { %735 = vmatpush1.bf16.msra.mxu1 %v1117_v46 }
  0xa5   : > { %736 = vmatprep.subr.bf16.mxu1 %v1118_v47 }
  0xa8   : > { %737 = vmatpush1.bf16.msra.mxu1 %v1120_v48 }
  0xa9   : > { %738 = vmatprep.subr.bf16.mxu1 %v1121_v49 }
  0xac   : > { %739 = vmatpush1.bf16.msra.mxu1 %v1123_v50 }
 0x15e   : > { %v433_v58 = vpop.f32.mrb[0].mxu0 }
 0x15f   : > { %v1554_v59 = vadd.f32 %v433_v58, %v300_v56  ;;  %v435_v60 = vpop.f32.mrb[1].mxu0 }
 0x160   : > { %v1556_v61 = vadd.f32 %v435_v60, %v304_v57  ;;  %v437_v62 = vpop.f32.mrb[2].mxu0 }
 0x161   : > { %v452_v63 = vsub.f32 0.0, %v1554_v59  ;;  %v1559_v0 = vadd.f32 %v437_v62, %v300_v56  ;;  %v439_v1 = vpop.f32.mrb[3].mxu0 }
 0x162   : > { %v453_v2 = vsub.f32 0.0, %v1556_v61  ;;  %v440_v3 = vadd.f32 %v439_v1, %v304_v57 }
 0x163   : > { %v460_v4 = vmul.f32 1.442695, %v452_v63  ;;  %v454_v5 = vsub.f32 0.0, %v1559_v0 }
 0x164   : > { %v462_v6 = vmul.f32 1.442695, %v453_v2  ;;  %v455_v7 = vsub.f32 0.0, %v440_v3 }
 0x165   : > { %1124 = vpow2.f32 %v460_v4  ;;  %v464_v8 = vmul.f32 1.442695, %v454_v5 }
 0x166   : > { %1126 = vpow2.f32 %v462_v6  ;;  %v466_v9 = vmul.f32 1.442695, %v455_v7  ;;  %v443_v10 = vpop.f32.mrb[4].mxu0 }
 0x167   : > { %1128 = vpow2.f32 %v464_v8  ;;  %v444_v11 = vadd.f32 %v443_v10, %v300_v56  ;;  %v445_v12 = vpop.f32.mrb[5].mxu0 }
 0x168   : > { %1130 = vpow2.f32 %v466_v9  ;;  %v446_v13 = vadd.f32 %v445_v12, %v304_v57  ;;  %v447_v14 = vpop.f32.mrb[6].mxu0 }
 0x169   : > { %v456_v15 = vsub.f32 0.0, %v444_v11  ;;  %v448_v16 = vadd.f32 %v447_v14, %v300_v56  ;;  %v449_v17 = vpop.f32.mrb[7].mxu0 }
 0x16a   : > { %v457_v18 = vsub.f32 0.0, %v446_v13  ;;  %v450_v19 = vadd.f32 %v449_v17, %v304_v57 }
 0x16b   : > { %v468_v20 = vmul.f32 1.442695, %v456_v15  ;;  %v458_v21 = vsub.f32 0.0, %v448_v16 }
 0x16c   : > { %v470_v22 = vmul.f32 1.442695, %v457_v18  ;;  %v459_v23 = vsub.f32 0.0, %v450_v19 }
 0x16d   : > { %1132 = vpow2.f32 %v468_v20  ;;  %v472_v24 = vmul.f32 1.442695, %v458_v21 }
 0x16e   : > { %1134 = vpow2.f32 %v470_v22  ;;  %v474_v25 = vmul.f32 1.442695, %v459_v23 }
 0x16f   : > { %v1125_v26 = vpop.eup %1124  ;;  %1136 = vpow2.f32 %v472_v24 }
 0x170   : > { %v1127_v27 = vpop.eup %1126  ;;  %v476_v28 = vadd.f32 1.0, %v1125_v26  ;;  %1138 = vpow2.f32 %v474_v25 }
 0x171   : > { %v1129_v29 = vpop.eup %1128  ;;  %v477_v30 = vadd.f32 1.0, %v1127_v27 }
 0x172   : > { %v1131_v31 = vpop.eup %1130  ;;  %1140 = vrcp.f32 %v476_v28  ;;  %v478_v32 = vadd.f32 1.0, %v1129_v29 }
 0x173   : > { %1142 = vrcp.f32 %v477_v30  ;;  %v479_v33 = vadd.f32 1.0, %v1131_v31 }
 0x174   : > { %1144 = vrcp.f32 %v478_v32 }
 0x175   : > { %1146 = vrcp.f32 %v479_v33 }
 0x177   : > { %v1133_v34 = vpop.eup %1132 }
 0x178   : > { %v1135_v35 = vpop.eup %1134  ;;  %v480_v36 = vadd.f32 1.0, %v1133_v34 }
 0x179   : > { %v1137_v37 = vpop.eup %1136  ;;  %v481_v38 = vadd.f32 1.0, %v1135_v35 }
 0x17a   : > { %v1139_v39 = vpop.eup %1138  ;;  %1148 = vrcp.f32 %v480_v36  ;;  %v482_v40 = vadd.f32 1.0, %v1137_v37 }
 0x17b   : > { %1150 = vrcp.f32 %v481_v38  ;;  %v483_v41 = vadd.f32 1.0, %v1139_v39 }
 0x17c   : > { %v1141_v42 = vpop.eup %1140  ;;  %1152 = vrcp.f32 %v482_v40 }
 0x17d   : > { %v1143_v43 = vpop.eup %1142  ;;  %1154 = vrcp.f32 %v483_v41  ;;  %v492_v46 = vmul.f32 %v1141_v42, %v1554_v59 }
 0x17e   : > { %v1145_v44 = vpop.eup %1144  ;;  %v493_v48 = vmul.f32 %v1143_v43, %v1556_v61  ;;  %v536_v61 = vld [vmem:[%s1628_s4] sm:$0x3] }
 0x17f   : > { %v1147_v45 = vpop.eup %1146  ;;  %v494_v47 = vmul.f32 %v1145_v44, %v1559_v0  ;;  %v541_v0 = vrot.slane %v536_v61, %v299_v53 }
 0x180   : > { %v495_v49 = vmul.f32 %v1147_v45, %v440_v3  ;;  %v545_v3 = vrot.slane %v536_v61, %v303_v55 }
 0x181   : > { %v500_v50 = vpack.c.bf16 %v494_v47, %v492_v46 }
 0x182   : > { %v501_v51 = vpack.c.bf16 %v495_v49, %v493_v48 }
 0x184   : > { %v1149_v54 = vpop.eup %1148  ;;  %740 = vmatprep.mubr.bf16.mxu1 %v501_v51 }
 0x185   : > { %v1151_v56 = vpop.eup %1150  ;;  %741 = vmatmul.mubr.bf16.vlgmr.msra.gmra.mrb[0].mxu1 %v500_v50  ;;  %v496_v60 = vmul.f32 %v1149_v54, %v444_v11 }
 0x186   : > { %v1153_v57 = vpop.eup %1152  ;;  %v497_v63 = vmul.f32 %v1151_v56, %v446_v13 }
 0x187   : > { %v1155_v58 = vpop.eup %1154  ;;  %v498_v62 = vmul.f32 %v1153_v57, %v448_v16 }
 0x188   : > { %v499_v1 = vmul.f32 %v1155_v58, %v450_v19 }
 0x189   : > { %v502_v2 = vpack.c.bf16 %v498_v62, %v496_v60 }
 0x18a   : > { %v503_v59 = vpack.c.bf16 %v499_v1, %v497_v63 }
 0x18c   : > { %750 = vmatprep.mubr.bf16.mxu1 %v503_v59 }
 0x18d   : > { %751 = vmatmul.mubr.bf16.gmra.mrb[4].mxu1 %v502_v2 }
 0x258   : > { %v742_v4 = vpop.f32.mrb[0].mxu1 }
 0x259   : > { %v743_v5 = vadd.f32 %v742_v4, %v541_v0  ;;  %v744_v6 = vpop.f32.mrb[1].mxu1 }
 0x25a   : > { %v745_v7 = vadd.f32 %v744_v6, %v545_v3  ;;  %v746_v8 = vpop.f32.mrb[2].mxu1 }
 0x25b   : > { %v747_v9 = vadd.f32 %v746_v8, %v541_v0  ;;  %v748_v10 = vpop.f32.mrb[3].mxu1 }
 0x25c   : > { %v970_v11 = vpack.c.bf16 %v745_v7, %v743_v5  ;;  %v749_v12 = vadd.f32 %v748_v10, %v545_v3 }
 0x25e   : > { %785 = vst [vmem:[%s271_s28] sm:$0xff] %v970_v11  ;;  %v971_v13 = vpack.c.bf16 %v749_v12, %v747_v9 }
 0x260   : > { %786 = vst [vmem:[%s271_s28 + $0x8] sm:$0xff] %v971_v13  ;;  %v752_v14 = vpop.f32.mrb[4].mxu1 }
 0x261   : > { %v753_v52 = vadd.f32 %v752_v14, %v541_v0  ;;  %v754_v53 = vpop.f32.mrb[5].mxu1 }
 0x262   : > { %v755_v55 = vadd.f32 %v754_v53, %v545_v3  ;;  %v756_v15 = vpop.f32.mrb[6].mxu1 }
 0x263   : > { %v757_v16 = vadd.f32 %v756_v15, %v541_v0  ;;  %v758_v17 = vpop.f32.mrb[7].mxu1 }
 0x264   : > { %v972_v18 = vpack.c.bf16 %v755_v55, %v753_v52  ;;  %v759_v19 = vadd.f32 %v758_v17, %v545_v3 }
 0x266   : > { %787 = vst [vmem:[%s271_s28 + $0x10] sm:$0xff] %v972_v18  ;;  %v973_v20 = vpack.c.bf16 %v759_v19, %v757_v16 }
 0x268   : > { %788 = vst [vmem:[%s271_s28 + $0x18] sm:$0xff] %v973_v20 }
 0x269   : > { %1255 = shalt.err (!%p1252_p2)
}
 0x26a   : > { %s1256_s24 = scalar_lea.hbm %s1580_s12, 512  ;;  %s1260_s10 = scalar_lea.hbm %s1629_s5, 1024 }
 0x26b   : > { %p1257_p13 = scmp.ne.s32.totalorder %s1580_s12, %s1256_s24  ;;  %p1261_p4 = scmp.lt.u32.totalorder %s1580_s12, %s1629_s5 }
 0x26c   : > { %p1262_p5 = scmp.lt.u32.totalorder %s1260_s10, %s1256_s24  ;;  %p1264_p11 = scmp.lt.u32.totalorder %s1256_s24, %s1580_s12 }
 0x26d   : > { %p1258_p6 = pnand %p1257_p13, %p1643_p0 }
 0x26e   : > { %p1263_p8 = por %p1262_p5, %p1261_p4 }
 0x26f   : > { %p1259_p10 = pneg %p1258_p6 }
 0x270   : > { %p1265_p1 = por %p1264_p11, %p1263_p8 }
 0x272   : > { %p1266_p3 = pnand %p1265_p1, %p1259_p10 }
 0x274   : > { %1269 = shalt.err (!%p1266_p3)
}
 0x275   : > { %s1323_s15 = smov 128   ;;  %s1324_s16 = smov 8  }
 0x276   : > { %986 = dma.vmem_to_hbm [thread:$0]  (%p1643_p0), %s1575_s30, 512, %s1580_s12, %s790_s13, %s1323_s15, %s1323_s15, %s1324_s16  }
 0x277 PF: > { %s819_s9 = sand.u32 1, %s1300_s18   ;;  %p1644_p7 = scmp.ne.s32.totalorder %s1634_s25, 0 }
 0x278   : > { %p1645_p9 = scmp.ge.s32.totalorder %s1312_s21, 2  ;;  %s820_s17 = scalar_lea.sflag [#allocation4], %s819_s9 }
 0x27a   : > { %p1000_p12 = pnand %p1645_p9, %p1644_p7 }
 0x27c   : > { %1295 = dma.done.wait (!%p1000_p12), %s820_s17, 512  }
 0x27d   : > { %1297 = vsyncadd (!%p1000_p12), %s820_s17, 4294966784  ;;  %p19_p2 = scmp.ge.s32.totalorder %s1465_s14, 4   ;;  %s1646_s18 = smov %s1304_s19 }
 0x27e   : > { %s1647_s19 = smov %s1308_s20  ;;  %s1648_s20 = smov %s1481_s27 }
 0x27f   : > { %s1649_s21 = smov %s1465_s14  ;;  %21 = sbr.rel (!%p19_p2) target bundleno = 6 (0x6), region = 93 }
 0x286   :  { %825 = vsyncpa [#allocation3], 1 }
 0x287   :  { %827 = vsyncpa [#allocation3 + $0x1], 1 }
 0x288   :  { %828 = vsyncpa [#allocation6], 1 }
 0x289   :  { %829 = vsyncpa [#allocation4], 1 }
 0x28a   :  { %831 = vsyncpa [#allocation4 + $0x1], 1 }

</bundles_post_ra>
